<compile_context>
chip_gen: v5e
topology: v5e:2x2
jax: 0.10.0
libtpu: 0.0.40
codegen_flags: <defaults>
</compile_context>

<pallas_src>
import numpy as np
import jax
import jax.numpy as jnp
from jax.experimental import pallas as pl
from jax.experimental.pallas import tpu as pltpu

B = 2               # batch size for the demo

D_IN = 784          # module input: view(B, 1, 16, 7, 7) == 784 elements
C_OUT = 62          # conv output channels
S_OUT = 350         # 14*5*5 conv output spatial positions
K_FLAT = C_OUT * S_OUT          # 21700 (Linear f1 in_features)

N1, N2, N3, N4 = 125, 64, 47, 10

_VMEM_FULL = pl.BlockSpec(memory_space=pltpu.MemorySpace.VMEM)


# ----------------------------- Pallas kernel ------------------------------- #

def _net_kernel(x_ref, w_in_ref, w3_ref, w4_ref, o_ref):
    # x_ref   : (B, 784)  f32   raw flattened input
    # w_in_ref: (784, 64) f32   composite conv∘flatten∘f1∘f2 matrix (folded)
    # w3_ref  : (64, 47)  f32   W3^T
    # w4_ref  : (47, 10)  f32   W4^T
    # o_ref   : (B, 10)   f32   log-probabilities
    h = jnp.dot(x_ref[...], w_in_ref[...],
                preferred_element_type=jnp.float32)            # f0+f1+f2 folded
    h = jnp.tanh(h)                                            # f3
    h = jnp.dot(h, w3_ref[...], preferred_element_type=jnp.float32)   # f4
    h = jnp.tanh(h)                                            # f5
    logits = jnp.dot(h, w4_ref[...], preferred_element_type=jnp.float32)  # f6
    m = jnp.max(logits, axis=1, keepdims=True)                 # f7: LogSoftmax
    lse = m + jnp.log(jnp.sum(jnp.exp(logits - m), axis=1, keepdims=True))
    o_ref[...] = logits - lse


# ------------------------------ JAX wrapper -------------------------------- #

def net_pallas(x, w_in, w3t, w4t):
    b = x.shape[0]
    return pl.pallas_call(
        _net_kernel,
        out_shape=jax.ShapeDtypeStruct((b, N4), jnp.float32),
        in_specs=[_VMEM_FULL, _VMEM_FULL, _VMEM_FULL, _VMEM_FULL],
        out_specs=_VMEM_FULL,
        compiler_params=pltpu.CompilerParams(
            vmem_limit_bytes=4 * 1024 * 1024),
    )(x, w_in, w3t, w4t)


@jax.jit
def forward(x, params):
    w_in, w3t, w4t = params
    return net_pallas(x, w_in, w3t, w4t)      # (B, 10) log-probabilities


# ------------------------- deterministic parameters ------------------------ #

def init_params(key):
    ks = jax.random.split(key, 5)

    def u(k, shape, fan_in):
        bound = 1.0 / np.sqrt(fan_in)
        return jax.random.uniform(k, shape, jnp.float32, -bound, bound)

    w_conv = u(ks[0], (62, 1, 3, 3, 3), 27)       # Conv3d f0, bias=False
    w1 = u(ks[1], (N1, K_FLAT), K_FLAT)           # Linear f1
    w2 = u(ks[2], (N2, N1), N1)                   # Linear f2
    w3 = u(ks[3], (N3, N2), N2)                   # Linear f4
    w4 = u(ks[4], (N4, N3), N3)                   # Linear f6
    return w_conv, w1, w2, w3, w4


def prepare_params(raw):
    """ONE-TIME weight prep (outside the per-call jit).

    f0 (Conv3d, no bias), the flatten view, f1 and f2 are all linear with no
    nonlinearity between them, so their composition is a single (784, 64)
    matrix.  We materialize it by pushing the 784-element identity basis
    through the reference conv (f32) and the two weight matrices, which is
    exactly the linear map the module applies to the input.
    W3/W4 are merely pre-transposed (they sit behind tanh so they can't fold).
    """
    w_conv, w1, w2, w3, w4 = raw

    eye = jnp.eye(D_IN, dtype=jnp.float32).reshape(D_IN, 1, 16, 7, 7)
    conv_basis = jax.lax.conv_general_dilated(
        eye, w_conv, window_strides=(1, 1, 1), padding="VALID",
        dimension_numbers=("NCDHW", "OIDHW", "NCDHW"))          # (784, 62, 14, 5, 5)
    a = conv_basis.reshape(D_IN, K_FLAT)                        # (784, 21700)
    w_in = (a @ w1.T) @ w2.T                                    # (784, 64) f32

    return (jnp.asarray(w_in, jnp.float32),
            jnp.asarray(w3.T, jnp.float32),
            jnp.asarray(w4.T, jnp.float32))


# ---------------------------- pure-JAX reference ---------------------------- #

def reference(x, raw_params):
    w_conv, w1, w2, w3, w4 = raw_params
    b = x.shape[0]
    x5 = x.reshape(b, 1, 16, 7, 7)
    y = jax.lax.conv_general_dilated(
        x5, w_conv, window_strides=(1, 1, 1), padding="VALID",
        dimension_numbers=("NCDHW", "OIDHW", "NCDHW"))
    y = y.reshape(b, K_FLAT)
    y = y @ w1.T
    y = y @ w2.T
    y = jnp.tanh(y)
    y = y @ w3.T
    y = jnp.tanh(y)
    y = y @ w4.T
    return jax.nn.log_softmax(y, axis=1)


# ----------------------------------- main ----------------------------------- #

if __name__ == "__main__":
    key = jax.random.PRNGKey(0)
    kx, kp = jax.random.split(key)
    # Original module views the input as (B, 1, 16, 7, 7) == B x 784 elements.
    x = jax.random.normal(kx, (B, D_IN), dtype=jnp.float32)

    raw = init_params(kp)
    params = prepare_params(raw)     # one-time fold of conv + f1 + f2

    out = jax.block_until_ready(forward(x, params))
    assert out.shape == (B, N4) and out.dtype == jnp.float32

    ref = reference(x, raw)
    np.testing.assert_allclose(np.asarray(out), np.asarray(ref),
                               rtol=2e-2, atol=2e-2)
    print("KERNEL_OK")
</pallas_src>

<mosaic_0001>
module attributes {stable_mosaic.version = 11 : i64} {
  func.func @_net_kernel(%arg0: memref<2x784xf32, #tpu.memory_space<vmem>>, %arg1: memref<784x64xf32, #tpu.memory_space<vmem>>, %arg2: memref<64x47xf32, #tpu.memory_space<vmem>>, %arg3: memref<47x10xf32, #tpu.memory_space<vmem>>, %arg4: memref<2x10xf32, #tpu.memory_space<vmem>>) attributes {dimension_semantics = [], scalar_prefetch = 0 : i64, scratch_operands = 0 : i64, tpu.core_type = #tpu.core_type<tc>} {
    %c0 = arith.constant 0 : index
    %c0_0 = arith.constant 0 : index
    %0 = vector.load %arg0[%c0, %c0_0] : memref<2x784xf32, #tpu.memory_space<vmem>>, vector<2x784xf32>
    %c0_1 = arith.constant 0 : index
    %c0_2 = arith.constant 0 : index
    %1 = vector.load %arg1[%c0_1, %c0_2] : memref<784x64xf32, #tpu.memory_space<vmem>>, vector<784x64xf32>
    %cst = arith.constant dense<0.000000e+00> : vector<2x64xf32>
    %2 = tpu.matmul %0, %1, %cst {dimension_numbers = #tpu.dot_dimension_numbers<[1], [0], [0], [1], [0, 0, 1, 1], [], []>} : vector<2x784xf32>, vector<784x64xf32>, vector<2x64xf32> -> vector<2x64xf32>
    %3 = math.tanh %2 : vector<2x64xf32>
    %c0_3 = arith.constant 0 : index
    %c0_4 = arith.constant 0 : index
    %4 = vector.load %arg2[%c0_3, %c0_4] : memref<64x47xf32, #tpu.memory_space<vmem>>, vector<64x47xf32>
    %cst_5 = arith.constant dense<0.000000e+00> : vector<2x47xf32>
    %5 = tpu.matmul %3, %4, %cst_5 {dimension_numbers = #tpu.dot_dimension_numbers<[1], [0], [0], [1], [0, 0, 1, 1], [], []>} : vector<2x64xf32>, vector<64x47xf32>, vector<2x47xf32> -> vector<2x47xf32>
    %6 = math.tanh %5 : vector<2x47xf32>
    %c0_6 = arith.constant 0 : index
    %c0_7 = arith.constant 0 : index
    %7 = vector.load %arg3[%c0_6, %c0_7] : memref<47x10xf32, #tpu.memory_space<vmem>>, vector<47x10xf32>
    %cst_8 = arith.constant dense<0.000000e+00> : vector<2x10xf32>
    %8 = tpu.matmul %6, %7, %cst_8 {dimension_numbers = #tpu.dot_dimension_numbers<[1], [0], [0], [1], [0, 0, 1, 1], [], []>} : vector<2x47xf32>, vector<47x10xf32>, vector<2x10xf32> -> vector<2x10xf32>
    %cst_9 = arith.constant dense<0xFF800000> : vector<2xf32>
    %9 = vector.multi_reduction <maximumf>, %8, %cst_9 [1] : vector<2x10xf32> to vector<2xf32>
    %10 = vector.shape_cast %9 : vector<2xf32> to vector<2x1xf32>
    %11 = vector.broadcast %10 : vector<2x1xf32> to vector<2x10xf32>
    %12 = arith.subf %8, %11 : vector<2x10xf32>
    %13 = math.exp %12 : vector<2x10xf32>
    %cst_10 = arith.constant dense<0.000000e+00> : vector<2xf32>
    %14 = vector.multi_reduction <add>, %13, %cst_10 [1] : vector<2x10xf32> to vector<2xf32>
    %15 = vector.shape_cast %14 : vector<2xf32> to vector<2x1xf32>
    %16 = math.log %15 : vector<2x1xf32>
    %17 = arith.addf %10, %16 : vector<2x1xf32>
    %18 = vector.broadcast %17 : vector<2x1xf32> to vector<2x10xf32>
    %19 = arith.subf %8, %18 : vector<2x10xf32>
    %c0_11 = arith.constant 0 : index
    %c0_12 = arith.constant 0 : index
    %20 = vector.load %arg4[%c0_11, %c0_12] : memref<2x10xf32, #tpu.memory_space<vmem>>, vector<2x10xf32>
    tpu.vector_store %arg4[%c0_11, %c0_12], %19 {strides = array<i32>} : memref<2x10xf32, #tpu.memory_space<vmem>>, vector<2x10xf32>,
    return
  }
}

</mosaic_0001>

<bundles_post_ra>
// kernel: forward.1
= control target key start
LH: loop header
LB: loop body
LE: loop exit
PB: predicated region body
PF: predicated region fallthrough
CT: control target
= control target key end

     0   :  { %s791_s0 = inlined_call_operand.vmem [shape: f32[2,784], index: 0, kind: input, shape index: {}]   ;;  %s792_s1 = inlined_call_operand.vmem [shape: f32[784,64], index: 1, kind: input, shape index: {}]   ;;  %s793_s2 = inlined_call_operand.vmem [shape: f32[64,47], index: 2, kind: input, shape index: {}]   ;;  %s794_s3 = inlined_call_operand.vmem [shape: f32[47,10], index: 3, kind: input, shape index: {}]   ;;  %s795_s4 = inlined_call_operand.hbm [shape: f32[2,10], index: 4, kind: output, shape index: {}]  }
   0x1   :  { %v35_v0 = vld [vmem:[%s792_s1 + $0x78] sm:$0xff]  ;;  %v34_v1 = vld [vmem:[%s792_s1 + $0x70] sm:$0xff]  ;;  %v33_v4 = vld [vmem:[%s792_s1 + $0x68] sm:$0xff] }
   0x2   :  { %v51_v2 = vld [vmem:[%s792_s1 + $0xf8] sm:$0xff]  ;;  %139 = vmatpush.msra.mxu0 %v35_v0  ;;  %v50_v3 = vld [vmem:[%s792_s1 + $0xf0] sm:$0xff]  ;;  %v49_v5 = vld [vmem:[%s792_s1 + $0xe8] sm:$0xff] }
   0x3   :  { %159 = vmatpush.msra.mxu1 %v51_v2  ;;  %v32_v6 = vld [vmem:[%s792_s1 + $0x60] sm:$0xff]  ;;  %v31_v8 = vld [vmem:[%s792_s1 + $0x58] sm:$0xff]  ;;  %v66_v11 = vld [vmem:[%s792_s1 + $0x170] sm:$0xff] }
   0x4   :  { %140 = vmatpush.msra.mxu0 %v34_v1  ;;  %v48_v7 = vld [vmem:[%s792_s1 + $0xe0] sm:$0xff]  ;;  %v47_v9 = vld [vmem:[%s792_s1 + $0xd8] sm:$0xff]  ;;  %v30_v13 = vld [vmem:[%s792_s1 + $0x50] sm:$0xff] }
   0x5   :  { %160 = vmatpush.msra.mxu1 %v50_v3  ;;  %v67_v10 = vld [vmem:[%s792_s1 + $0x178] sm:$0xff]  ;;  %v46_v14 = vld [vmem:[%s792_s1 + $0xd0] sm:$0xff]  ;;  %v65_v15 = vld [vmem:[%s792_s1 + $0x168] sm:$0xff] }
   0x6   :  { %141 = vmatpush.msra.mxu0 %v33_v4  ;;  %v83_v12 = vld [vmem:[%s792_s1 + $0x1f8] sm:$0xff]  ;;  %179 = vmatpush.msra.mxu2 %v67_v10  ;;  %v82_v16 = vld [vmem:[%s792_s1 + $0x1f0] sm:$0xff]  ;;  %v29_v17 = vld [vmem:[%s792_s1 + $0x48] sm:$0xff] }
   0x7   :  { %161 = vmatpush.msra.mxu1 %v49_v5  ;;  %199 = vmatpush.msra.mxu3 %v83_v12  ;;  %v45_v18 = vld [vmem:[%s792_s1 + $0xc8] sm:$0xff]  ;;  %v64_v20 = vld [vmem:[%s792_s1 + $0x160] sm:$0xff]  ;;  %v63_v24 = vld [vmem:[%s792_s1 + $0x158] sm:$0xff] }
   0x8   :  { %142 = vmatpush.msra.mxu0 %v32_v6  ;;  %180 = vmatpush.msra.mxu2 %v66_v11  ;;  %v81_v19 = vld [vmem:[%s792_s1 + $0x1e8] sm:$0xff]  ;;  %v80_v21 = vld [vmem:[%s792_s1 + $0x1e0] sm:$0xff]  ;;  %v79_v25 = vld [vmem:[%s792_s1 + $0x1d8] sm:$0xff] }
   0x9   :  { %162 = vmatpush.msra.mxu1 %v48_v7  ;;  %200 = vmatpush.msra.mxu3 %v82_v16  ;;  %v28_v22 = vld [vmem:[%s792_s1 + $0x40] sm:$0xff]  ;;  %v27_v26 = vld [vmem:[%s792_s1 + $0x38] sm:$0xff]  ;;  %v62_v28 = vld [vmem:[%s792_s1 + $0x150] sm:$0xff] }
   0xa   :  { %143 = vmatpush.msra.mxu0 %v31_v8  ;;  %v44_v23 = vld [vmem:[%s792_s1 + $0xc0] sm:$0xff]  ;;  %181 = vmatpush.msra.mxu2 %v65_v15  ;;  %v43_v27 = vld [vmem:[%s792_s1 + $0xb8] sm:$0xff]  ;;  %v78_v29 = vld [vmem:[%s792_s1 + $0x1d0] sm:$0xff] }
   0xb   :  { %163 = vmatpush.msra.mxu1 %v47_v9  ;;  %201 = vmatpush.msra.mxu3 %v81_v19  ;;  %v26_v30 = vld [vmem:[%s792_s1 + $0x30] sm:$0xff]  ;;  %v61_v32 = vld [vmem:[%s792_s1 + $0x148] sm:$0xff]  ;;  %v60_v36 = vld [vmem:[%s792_s1 + $0x140] sm:$0xff] }
   0xc   :  { %144 = vmatpush.msra.mxu0 %v30_v13  ;;  %182 = vmatpush.msra.mxu2 %v64_v20  ;;  %v42_v31 = vld [vmem:[%s792_s1 + $0xb0] sm:$0xff]  ;;  %v77_v33 = vld [vmem:[%s792_s1 + $0x1c8] sm:$0xff]  ;;  %v76_v37 = vld [vmem:[%s792_s1 + $0x1c0] sm:$0xff] }
   0xd   :  { %164 = vmatpush.msra.mxu1 %v46_v14  ;;  %202 = vmatpush.msra.mxu3 %v80_v21  ;;  %v25_v34 = vld [vmem:[%s792_s1 + $0x28] sm:$0xff]  ;;  %v24_v38 = vld [vmem:[%s792_s1 + $0x20] sm:$0xff]  ;;  %v59_v40 = vld [vmem:[%s792_s1 + $0x138] sm:$0xff] }
   0xe   :  { %145 = vmatpush.msra.mxu0 %v29_v17  ;;  %183 = vmatpush.msra.mxu2 %v63_v24  ;;  %v41_v35 = vld [vmem:[%s792_s1 + $0xa8] sm:$0xff]  ;;  %v40_v39 = vld [vmem:[%s792_s1 + $0xa0] sm:$0xff]  ;;  %v75_v41 = vld [vmem:[%s792_s1 + $0x1b8] sm:$0xff] }
   0xf   :  { %165 = vmatpush.msra.mxu1 %v45_v18  ;;  %203 = vmatpush.msra.mxu3 %v79_v25  ;;  %v23_v42 = vld [vmem:[%s792_s1 + $0x18] sm:$0xff]  ;;  %v58_v44 = vld [vmem:[%s792_s1 + $0x130] sm:$0xff]  ;;  %v57_v48 = vld [vmem:[%s792_s1 + $0x128] sm:$0xff] }
  0x10   :  { %146 = vmatpush.msra.mxu0 %v28_v22  ;;  %184 = vmatpush.msra.mxu2 %v62_v28  ;;  %v39_v43 = vld [vmem:[%s792_s1 + $0x98] sm:$0xff]  ;;  %v74_v45 = vld [vmem:[%s792_s1 + $0x1b0] sm:$0xff]  ;;  %v73_v49 = vld [vmem:[%s792_s1 + $0x1a8] sm:$0xff] }
  0x11   :  { %166 = vmatpush.msra.mxu1 %v44_v23  ;;  %204 = vmatpush.msra.mxu3 %v78_v29  ;;  %v22_v46 = vld [vmem:[%s792_s1 + $0x10] sm:$0xff]  ;;  %v21_v50 = vld [vmem:[%s792_s1 + $0x8] sm:$0xff]  ;;  %v56_v52 = vld [vmem:[%s792_s1 + $0x120] sm:$0xff] }
  0x12   :  { %147 = vmatpush.msra.mxu0 %v27_v26  ;;  %185 = vmatpush.msra.mxu2 %v61_v32  ;;  %v38_v47 = vld [vmem:[%s792_s1 + $0x90] sm:$0xff]  ;;  %v37_v51 = vld [vmem:[%s792_s1 + $0x88] sm:$0xff]  ;;  %v72_v53 = vld [vmem:[%s792_s1 + $0x1a0] sm:$0xff] }
  0x13   :  { %167 = vmatpush.msra.mxu1 %v43_v27  ;;  %205 = vmatpush.msra.mxu3 %v77_v33  ;;  %v18_v54 = vld [vmem:[%s791_s0] sm:$0xff]  ;;  %v99_v57 = vld [vmem:[%s792_s1 + $0x278] sm:$0xff]  ;;  %v98_v61 = vld [vmem:[%s792_s1 + $0x270] sm:$0xff] }
  0x14   :  { %148 = vmatpush.msra.mxu0 %v26_v30  ;;  %186 = vmatpush.msra.mxu2 %v60_v36  ;;  %v20_v55 = vld [vmem:[%s792_s1] sm:$0xff]  ;;  %120 = vst [vmem:[#allocation1] ss:$4 sm:$0xff] %v18_v54  ;;  %v115_v58 = vld [vmem:[%s792_s1 + $0x2f8] sm:$0xff]  ;;  %v114_v62 = vld [vmem:[%s792_s1 + $0x2f0] sm:$0xff] }
  0x15   :  { %168 = vmatpush.msra.mxu1 %v42_v31  ;;  %206 = vmatpush.msra.mxu3 %v76_v37  ;;  %v36_v56 = vld [vmem:[%s792_s1 + $0x80] sm:$0xff]  ;;  %v55_v59 = vld [vmem:[%s792_s1 + $0x118] sm:$0xff]  ;;  %v54_v63 = vld [vmem:[%s792_s1 + $0x110] sm:$0xff] }
  0x16   :  { %149 = vmatpush.msra.mxu0 %v25_v34  ;;  %187 = vmatpush.msra.mxu2 %v59_v40  ;;  %v71_v60 = vld [vmem:[%s792_s1 + $0x198] sm:$0xff]  ;;  %v70_v0 = vld [vmem:[%s792_s1 + $0x190] sm:$0xff]  ;;  %v19_v1 = vld [vmem:[%s791_s0 + $0x8] sm:$0x3f] }
  0x17   :  { %169 = vmatpush.msra.mxu1 %v41_v35  ;;  %207 = vmatpush.msra.mxu3 %v75_v41  ;;  %v97_v2 = vld [vmem:[%s792_s1 + $0x268] sm:$0xff]  ;;  %122 = vst [vmem:[#allocation1 + $0x20] ss:$4 sm:$0xff] %v19_v1 }
  0x18   :  { %150 = vmatpush.msra.mxu0 %v24_v38  ;;  %188 = vmatpush.msra.mxu2 %v58_v44  ;;  %v113_v3 = vld [vmem:[%s792_s1 + $0x2e8] sm:$0xff] }
  0x19   :  { %170 = vmatpush.msra.mxu1 %v40_v39  ;;  %208 = vmatpush.msra.mxu3 %v74_v45 }
  0x1a   :  { %151 = vmatpush.msra.mxu0 %v23_v42  ;;  %189 = vmatpush.msra.mxu2 %v57_v48 }
  0x1b   :  { %171 = vmatpush.msra.mxu1 %v39_v43  ;;  %209 = vmatpush.msra.mxu3 %v73_v49 }
  0x1c   :  { %152 = vmatpush.msra.mxu0 %v22_v46  ;;  %190 = vmatpush.msra.mxu2 %v56_v52 }
  0x1d   :  { %172 = vmatpush.msra.mxu1 %v38_v47  ;;  %210 = vmatpush.msra.mxu3 %v72_v53 }
  0x1e   :  { %153 = vmatpush.msra.mxu0 %v21_v50  ;;  %191 = vmatpush.msra.mxu2 %v55_v59 }
  0x1f   :  { %173 = vmatpush.msra.mxu1 %v37_v51  ;;  %211 = vmatpush.msra.mxu3 %v71_v60 }
  0x20   :  { %154 = vmatpush.msra.mxu0 %v20_v55 }
  0x21   :  { %174 = vmatpush.msra.mxu1 %v36_v56 }
  0x22   :  { %219 = vmatpush.msrb.mxu0 %v99_v57 }
  0x23   :  { %239 = vmatpush.msrb.mxu1 %v115_v58 }
  0x24   :  { %9 = vsyncpa [#allocation3], 0  ;;  %220 = vmatpush.msrb.mxu0 %v98_v61  ;;  %v53_v4 = vld [vmem:[%s792_s1 + $0x108] sm:$0xff]  ;;  %v96_v6 = vld [vmem:[%s792_s1 + $0x260] sm:$0xff]  ;;  %192 = vmatpush.msra.mxu2 %v54_v63  ;;  %vm136_vm0 = vcmask 130048   ;;  %vm323_vm1 = vcmask 1046528  }
  0x25   :  { %240 = vmatpush.msrb.mxu1 %v114_v62  ;;  %v69_v5 = vld [vmem:[%s792_s1 + $0x188] sm:$0xff]  ;;  %v112_v7 = vld [vmem:[%s792_s1 + $0x2e0] sm:$0xff]  ;;  %212 = vmatpush.msra.mxu3 %v70_v0  ;;  %v95_v10 = vld [vmem:[%s792_s1 + $0x258] sm:$0xff]  ;;  %vm288_vm2 = vcmask 523264   ;;  %vm319_vm3 = vcmask 384000   ;;  %vm347_vm4 = vcmask 74752  }
  0x26   :  { %221 = vmatpush.msrb.mxu0 %v97_v2  ;;  %v52_v8 = vld [vmem:[%s792_s1 + $0x100] sm:$0xff]  ;;  %v111_v11 = vld [vmem:[%s792_s1 + $0x2d8] sm:$0xff]  ;;  %193 = vmatpush.msra.mxu2 %v53_v4  ;;  %v125_v12 = vld.sshfl [vmem:[#allocation1 + $0x10] sm:$0xff pattern:$0x73625140]  ;;  %s369_s6 = sshll.u32 %s795_s4, 4  ;;  %s370_s6 = int_to_ptr.hbm [resolvable:$true] %s369_s6 }
  0x27   :  { %241 = vmatpush.msrb.mxu1 %v113_v3  ;;  %v68_v9 = vld [vmem:[%s792_s1 + $0x180] sm:$0xff]  ;;  %213 = vmatpush.msra.mxu3 %v69_v5  ;;  %v126_v13 = vld.sshfl [vmem:[#allocation1 + $0x18] sm:$0xff pattern:$0x73625140]  ;;  %v94_v14 = vld [vmem:[%s792_s1 + $0x250] sm:$0xff] }
  0x28   :  { %222 = vmatpush.msrb.mxu0 %v96_v6  ;;  %v110_v15 = vld [vmem:[%s792_s1 + $0x2d0] sm:$0xff]  ;;  %194 = vmatpush.msra.mxu2 %v52_v8  ;;  %v117_v16 = vld [vmem:[%s792_s1 + $0x308] sm:$0xff]  ;;  %v123_v17 = vld.sshfl [vmem:[#allocation1] sm:$0xff pattern:$0x73625140] }
  0x29   :  { %242 = vmatpush.msrb.mxu1 %v112_v7  ;;  %214 = vmatpush.msra.mxu3 %v68_v9  ;;  %v93_v18 = vld [vmem:[%s792_s1 + $0x248] sm:$0xff]  ;;  %v116_v21 = vld [vmem:[%s792_s1 + $0x300] sm:$0xff]  ;;  %v91_v24 = vld [vmem:[%s792_s1 + $0x238] sm:$0xff] }
  0x2a   :  { %223 = vmatpush.msrb.mxu0 %v95_v10  ;;  %v109_v19 = vld [vmem:[%s792_s1 + $0x2c8] sm:$0xff]  ;;  %195 = vmatmul.f32.vlgmr.msra.gmra.mxu2 %v125_v12  ;;  %v92_v22 = vld [vmem:[%s792_s1 + $0x240] sm:$0xff]  ;;  %v107_v25 = vld [vmem:[%s792_s1 + $0x2b8] sm:$0xff] }
  0x2b   :  { %243 = vmatpush.msrb.mxu1 %v111_v11  ;;  %215 = vmatmul.f32.vlgmr.msra.gmra.mxu3 %v126_v13  ;;  %v124_v20 = vld.sshfl [vmem:[#allocation1 + $0x8] sm:$0xff pattern:$0x73625140]  ;;  %v108_v23 = vld [vmem:[%s792_s1 + $0x2c0] sm:$0xff]  ;;  %v90_v27 = vld [vmem:[%s792_s1 + $0x230] sm:$0xff] }
  0x2c   :  { %224 = vmatpush.msrb.mxu0 %v94_v14  ;;  %273 = vmatpush.msrb.mxu2 %v117_v16  ;;  %v129_v26 = vld.sshfl [vmem:[#allocation1 + $0x30] sm:$0xff pattern:$0x73625140]  ;;  %v89_v29 = vld [vmem:[%s792_s1 + $0x228] sm:$0xff]  ;;  %v88_v31 = vld [vmem:[%s792_s1 + $0x220] sm:$0xff] }
  0x2d   :  { %244 = vmatpush.msrb.mxu1 %v110_v15  ;;  %155 = vmatmul.f32.vlgmr.msra.gmra.mxu0 %v123_v17  ;;  %v106_v28 = vld [vmem:[%s792_s1 + $0x2b0] sm:$0xff]  ;;  %v105_v30 = vld [vmem:[%s792_s1 + $0x2a8] sm:$0xff]  ;;  %v104_v32 = vld [vmem:[%s792_s1 + $0x2a0] sm:$0xff] }
  0x2e   :  { %225 = vmatpush.msrb.mxu0 %v93_v18  ;;  %175 = vmatmul.f32.vlgmr.msra.gmra.mxu1 %v124_v20  ;;  %v87_v33 = vld [vmem:[%s792_s1 + $0x218] sm:$0xff]  ;;  %v86_v35 = vld [vmem:[%s792_s1 + $0x210] sm:$0xff]  ;;  %v85_v37 = vld [vmem:[%s792_s1 + $0x208] sm:$0xff] }
  0x2f   :  { %245 = vmatpush.msrb.mxu1 %v109_v19  ;;  %274 = vmatpush.msrb.mxu2 %v116_v21  ;;  %v103_v34 = vld [vmem:[%s792_s1 + $0x298] sm:$0xff]  ;;  %v102_v36 = vld [vmem:[%s792_s1 + $0x290] sm:$0xff]  ;;  %v101_v38 = vld [vmem:[%s792_s1 + $0x288] sm:$0xff] }
  0x30   :  { %226 = vmatpush.msrb.mxu0 %v92_v22  ;;  %v84_v39 = vld [vmem:[%s792_s1 + $0x200] sm:$0xff]  ;;  %v128_v42 = vld.sshfl [vmem:[#allocation1 + $0x28] sm:$0xff pattern:$0x73625140]  ;;  %v287_v43 = vld [vmem:[%s793_s2 + $0x38] sm:$0xff] }
  0x31   :  { %246 = vmatpush.msrb.mxu1 %v108_v23  ;;  %v100_v40 = vld [vmem:[%s792_s1 + $0x280] sm:$0xff]  ;;  %300 = vmatpush.msrb.mxu3 %v287_v43  ;;  %v286_v44 = vld [vmem:[%s793_s2 + $0x30] sm:$0xff]  ;;  %v285_v45 = vld [vmem:[%s793_s2 + $0x28] sm:$0xff] }
  0x32   :  { %227 = vmatpush.msrb.mxu0 %v91_v24  ;;  %378 = vmatmul.msk.f32.vlgmr.msrb.gmra.mxu2 %vm136_vm0, %v129_v26  ;;  %v127_v41 = vld.sshfl [vmem:[#allocation1 + $0x20] sm:$0xff pattern:$0x73625140]  ;;  %v283_v47 = vld [vmem:[%s793_s2 + $0x18] sm:$0xff]  ;;  %v282_v48 = vld [vmem:[%s793_s2 + $0x10] sm:$0xff] }
  0x33   :  { %247 = vmatpush.msrb.mxu1 %v107_v25  ;;  %301 = vmatpush.msrb.mxu3 %v286_v44  ;;  %v284_v46 = vld [vmem:[%s793_s2 + $0x20] sm:$0xff]  ;;  %v281_v49 = vld [vmem:[%s793_s2 + $0x8] sm:$0xff]  ;;  %v316_v3 = vld [vmem:[%s794_s3 + $0x18] sm:$0xff] }
  0x34   :  { %228 = vmatpush.msrb.mxu0 %v90_v27  ;;  %v280_v50 = vld [vmem:[%s793_s2] sm:$0xff]  ;;  %v318_v51 = vld [vmem:[%s794_s3 + $0x28] sm:$0x7f]  ;;  %v315_v4 = vld [vmem:[%s794_s3 + $0x10] sm:$0xff] }
  0x35   :  { %248 = vmatpush.msrb.mxu1 %v106_v28  ;;  %302 = vmatpush.msrb.mxu3 %v285_v45  ;;  %v317_v52 = vld [vmem:[%s794_s3 + $0x20] sm:$0xff]  ;;  %v314_v5 = vld [vmem:[%s794_s3 + $0x8] sm:$0xff] }
  0x36   :  { %229 = vmatpush.msrb.mxu0 %v89_v29  ;;  %380 = vmatpush.msk.msra.mxu2 %vm323_vm1, %v318_v51  ;;  %v313_v6 = vld [vmem:[%s794_s3] sm:$0xff]  ;;  %s417_s3 = smov [#allocation2]  }
  0x37   :  { %249 = vmatpush.msrb.mxu1 %v105_v30  ;;  %303 = vmatpush.msrb.mxu3 %v284_v46  ;;  %s367_s29 = sshll.u32 %s417_s3, 4  ;;  %s368_s29 = int_to_ptr.vmem [resolvable:$true] %s367_s29 }
  0x38   :  { %230 = vmatpush.msrb.mxu0 %v88_v31  ;;  %338 = vmatpush.msra.mxu2 %v317_v52 }
  0x39   :  { %250 = vmatpush.msrb.mxu1 %v104_v32  ;;  %304 = vmatpush.msrb.mxu3 %v283_v47 }
  0x3a   :  { %231 = vmatpush.msrb.mxu0 %v87_v33  ;;  %339 = vmatpush.msra.mxu2 %v316_v3 }
  0x3b   :  { %251 = vmatpush.msrb.mxu1 %v103_v34  ;;  %305 = vmatpush.msrb.mxu3 %v282_v48 }
  0x3c   :  { %232 = vmatpush.msrb.mxu0 %v86_v35  ;;  %340 = vmatpush.msra.mxu2 %v315_v4 }
  0x3d   :  { %252 = vmatpush.msrb.mxu1 %v102_v36  ;;  %306 = vmatpush.msrb.mxu3 %v281_v49 }
  0x3e   :  { %233 = vmatpush.msrb.mxu0 %v85_v37  ;;  %341 = vmatpush.msra.mxu2 %v314_v5 }
  0x3f   :  { %253 = vmatpush.msrb.mxu1 %v101_v38  ;;  %307 = vmatpush.msrb.mxu3 %v280_v50 }
  0x40   :  { %234 = vmatpush.msrb.mxu0 %v84_v39  ;;  %342 = vmatpush.msra.mxu2 %v313_v6 }
  0x41   :  { %254 = vmatpush.msrb.mxu1 %v100_v40  ;;  %235 = vmatmul.f32.vlgmr.msrb.gmra.mxu0 %v127_v41 }
  0x42   :  { %255 = vmatmul.f32.vlgmr.msrb.gmra.mxu1 %v128_v42 }
  0xaa   :  { %v156_v53 = vpop.f32.mrf.mxu0 }
  0xab   :  { %v176_v54 = vpop.f32.mrf.mxu1 }
  0xac   :  { %v177_v55 = vadd.f32 %v176_v54, %v156_v53 }
  0xad   :  { %v196_v56 = vpop.f32.mrf.mxu2 }
  0xae   :  { %v197_v57 = vadd.f32 %v196_v56, %v177_v55  ;;  %v216_v58 = vpop.f32.mrf.mxu3 }
  0xb0   :  { %v217_v59 = vadd.f32 %v216_v58, %v197_v57 }
  0xb5   :  { %v276_v63 = vpop.f32.mrf.mxu2 }
  0xbe   :  { %v236_v60 = vpop.f32.mrf.mxu0 }
  0xbf   :  { %v256_v61 = vpop.f32.mrf.mxu1  ;;  %v237_v62 = vadd.f32 %v236_v60, %v217_v59 }
  0xc1   :  { %v257_v0 = vadd.f32 %v256_v61, %v237_v62 }
  0xc3   :  { %v277_v1 = vadd.f32 %v276_v63, %v257_v0 }
  0xc5   :  { %383 = vtanh.f32 %v277_v1 }
  0xcb   :  { %v384_v2 = vpop.eup %383 }
  0xcc   :  { %379 = vmatmul.msk.f32.vlgmr.msrb.gmra.mxu3 %vm288_vm2, %v384_v2 }
 0x14f   :  { %v309_v7 = vpop.f32.mrf.mxu3 }
 0x150   :  { %385 = vtanh.f32 %v309_v7 }
 0x156   :  { %v386_v8 = vpop.eup %385 }
 0x157   :  { %381 = vmatmul.msk.f32.vlgmr.msra.gmra.mxu2 %vm319_vm3, %v386_v8 }
 0x1da   :  { %v344_v9 = vpop.f32.mrf.mxu2 }
 0x1db   :  { %v348_v10 = vsel %vm347_vm4, %v344_v9, -inf }
 0x1dc   :  { %349 = vmax.xlane.f32.xlu0 %v348_v10 }
 0x24f   :  { %v350_v11 = vpop.xlane.xlu0 %349 }
 0x250   :  { %v351_v12 = vsub.f32 %v344_v9, %v350_v11 }
 0x252   :  { %v352_v13 = vmul.f32 1.442695, %v351_v12 }
 0x254   :  { %387 = vpow2.f32 %v352_v13 }
 0x25a   :  { %v388_v14 = vpop.eup %387 }
 0x25b   :  { %v354_v15 = vsel %vm347_vm4, %v388_v14, 0.0 }
 0x25c   :  { %355 = vadd.xlane.f32.xlu0 %v354_v15 }
 0x2cf   :  { %v356_v16 = vpop.xlane.xlu0 %355 }
 0x2d0   :  { %389 = vlog2.f32 %v356_v16 }
 0x2d6   :  { %v390_v17 = vpop.eup %389 }
 0x2d7   :  { %v358_v18 = vmul.f32 0.6931472, %v390_v17 }
 0x2d9   :  { %v359_v19 = vadd.f32 %v358_v18, %v350_v11 }
 0x2db   :  { %v360_v20 = vsub.f32 %v344_v9, %v359_v19 }
 0x2dd   :  { %361 = vst.msk [vmem:[#allocation2] sm:$0x3] %vm347_vm4, %v360_v20 }
 0x2de   :  { %372 = dma.vmem_to_hbm [thread:$0]  %s368_s29, 32, %s370_s6, [#allocation3]  }
 0x2df   :  { %415 = dma.done.wait [#allocation3], 32  }
 0x2e0   :  { %416 = vsyncadd [#allocation3], 4294967264 }
 0x2e1   :  { %377 = vsyncpa [#allocation3], 1 }

</bundles_post_ra>
